<compile_context>
chip_gen: v7x
topology: tpu7x:2x2x1
jax: 0.10.0
libtpu: 0.0.40
codegen_flags: <defaults>
</compile_context>

<pallas_src>
import jax
import jax.numpy as jnp
from jax.experimental import pallas as pl
from jax.experimental.pallas import tpu as pltpu


def _gpt2layer_tail_kernel(ntile_ref, h_ref, len_ref, w_ref, b_ref, o_ref,
                           acc_ref):
    """Grid = (batch tiles, sequence tiles); sequence is the reduction axis."""
    bi = pl.program_id(0)
    si = pl.program_id(1)
    s_tile = h_ref.shape[1]

    @pl.when(si == 0)
    def _init():
        acc_ref[...] = jnp.zeros_like(acc_ref)

    # ---- STPoolingAdapter masked sum over this S tile (skip padded tiles) --
    @pl.when(si <= ntile_ref[bi])
    def _accumulate():
        # Rebuild validity mask in-register from per-row token counts
        # (right-padded mask) instead of streaming a lane-padded [B,S,1] mask.
        s0 = si * s_tile
        pos = jax.lax.broadcasted_iota(
            jnp.int32, (h_ref.shape[0], s_tile, 1), 1) + s0
        valid = pos < len_ref[...]                      # [Bt, St, 1]
        h = h_ref[...]                                  # native dtype
        hm = jnp.where(valid, h, jnp.zeros_like(h))     # select, no f32 mul
        acc_ref[...] += jnp.sum(hm.astype(jnp.float32), axis=1)   # [Bt, D]

    @pl.when(si == pl.num_programs(1) - 1)
    def _finalize():
        # Masked sum -> L2 normalize.  The 1/token_count mean factor cancels
        # under L2 normalization, so it is dropped.
        s = acc_ref[...]                                          # [Bt, D]
        sq = jnp.sum(s * s, axis=-1, keepdims=True)               # [Bt, 1]
        inv_norm = jax.lax.rsqrt(jnp.maximum(sq, 1e-24))          # EUP rsqrt
        normed = s * inv_norm
        # out_mlp (Linear; weight pre-transposed & zero-padded to [D, Opad])
        y = jnp.dot(normed, w_ref[...], preferred_element_type=jnp.float32)
        y = jnp.tanh(y + b_ref[...])
        # out_dropout: identity at inference
        o_ref[...] = y.astype(o_ref.dtype)


def _vmem_capacity_bytes():
    try:
        return int(pltpu.get_tpu_info().vmem_capacity_bytes)
    except Exception:
        return 64 * 2**20   # conservative (v7x-sized)


def _choose_b_tile(B):
    # Prefer >= 2 batch tiles (dual-TC split of the "parallel" axis on v7x)
    # while keeping b_tile a multiple of 8; else largest multiple-of-8
    # divisor; else the full batch (legal via the "block dim == array dim"
    # rule).
    for t in (32, 16, 8):
        if B % t == 0 and B // t >= 2:
            return t
    for t in (32, 16, 8):
        if B % t == 0:
            return t
    return B


def _choose_s_tile(S, b_tile, D, itemsize, vmem_budget):
    # Keep the double-buffered hidden-state slab within ~60% of the scoped
    # VMEM budget; prefer the largest tile that fits (fewer grid steps,
    # closer to the HBM roofline).
    slab_cap = int(0.6 * vmem_budget)
    divisors = [t for t in (1024, 512, 256, 128, 64, 32, 16, 8) if S % t == 0]
    for t in divisors:
        if 2 * b_tile * t * D * itemsize <= slab_cap:
            return t
    return divisors[-1] if divisors else S


def gpt2layer_forward(last_hidden_state, attention_mask, out_mlp_w, out_mlp_b,
                      *, b_tile=None, s_tile=None):
    """Pallas tail of GPT2Layer.forward.

    Returns (embeddings, attentions=None, attention_mask_or_None), mirroring
    the module's output tuple for pad_mask=False, w_attentions=False.
    out_mlp_w is stored [D, O] (pre-transposed for x @ W); out_mlp_b is [1, O].
    """
    B, S, D = last_hidden_state.shape
    O = out_mlp_w.shape[1]
    itemsize = jnp.dtype(last_hidden_state.dtype).itemsize

    # Generation-aware scoped-VMEM budget (v7x: 64 MiB physical -> ~48 MiB).
    vmem_cap = _vmem_capacity_bytes()
    budget = 48 * 2**20 if vmem_cap <= 64 * 2**20 else 96 * 2**20

    if b_tile is None:
        b_tile = _choose_b_tile(B)
    if s_tile is None:
        s_tile = _choose_s_tile(S, b_tile, D, itemsize, budget)

    num_b_tiles = B // b_tile
    num_s_tiles = pl.cdiv(S, s_tile)

    # Lane-dense output: pad out_mlp's output dim to a multiple of 128.
    o_pad = max(128, 128 * pl.cdiv(O, 128))
    w = out_mlp_w
    b = out_mlp_b
    if o_pad != O:
        w = jnp.pad(w, ((0, 0), (0, o_pad - O)))
        b = jnp.pad(b, ((0, 0), (0, o_pad - O)))

    # Per-row token counts (right-padded mask) and per-batch-tile last valid
    # S-tile index (scalar-prefetched; lets the kernel skip padded tiles).
    lens = jnp.sum(attention_mask.astype(jnp.int32), axis=1)          # [B]
    lens3 = lens.reshape(B, 1, 1)                                     # [B,1,1]
    last_tile = jnp.clip((lens + s_tile - 1) // s_tile - 1, 0, num_s_tiles - 1)
    ntile = jnp.max(last_tile.reshape(num_b_tiles, b_tile), axis=1)
    ntile = ntile.astype(jnp.int32)                                   # [nBt]

    h_block_bytes = b_tile * s_tile * D * itemsize
    vmem_limit = int(min(budget, max(32 * 2**20, 3 * h_block_bytes)))

    grid = (num_b_tiles, num_s_tiles)

    out = pl.pallas_call(
        _gpt2layer_tail_kernel,
        out_shape=jax.ShapeDtypeStruct((B, o_pad), jnp.float32),
        grid_spec=pltpu.PrefetchScalarGridSpec(
            num_scalar_prefetch=1,
            grid=grid,
            in_specs=[
                # hidden states: clamp the S-tile index so fully padded tiles
                # reuse the last valid block (no re-DMA) and are skipped.
                pl.BlockSpec((b_tile, s_tile, D),
                             lambda bi, si, nt: (bi, jnp.minimum(si, nt[bi]), 0)),
                pl.BlockSpec((b_tile, 1, 1), lambda bi, si, nt: (bi, 0, 0)),
                pl.BlockSpec((D, o_pad), lambda bi, si, nt: (0, 0)),
                pl.BlockSpec((1, o_pad), lambda bi, si, nt: (0, 0)),
            ],
            out_specs=pl.BlockSpec((b_tile, o_pad),
                                   lambda bi, si, nt: (bi, 0)),
            scratch_shapes=[pltpu.VMEM((b_tile, D), jnp.float32)],
        ),
        compiler_params=pltpu.CompilerParams(
            dimension_semantics=("parallel", "arbitrary"),
            vmem_limit_bytes=vmem_limit,
        ),
    )(ntile, last_hidden_state, lens3, w, b)

    emb = out[:, :O]
    return emb, None, None


def reference_forward(last_hidden_state, attention_mask, out_mlp_w, out_mlp_b):
    h = last_hidden_state.astype(jnp.float32)
    m = attention_mask.astype(jnp.float32)
    sum_emb = jnp.sum(h * m[:, :, None], axis=1)
    sum_mask = jnp.maximum(jnp.sum(m, axis=1, keepdims=True), 1e-9)
    mean = sum_emb / sum_mask
    norm = jnp.sqrt(jnp.sum(mean * mean, axis=-1, keepdims=True))
    normed = mean / jnp.maximum(norm, 1e-12)
    return jnp.tanh(normed @ out_mlp_w + out_mlp_b)


if __name__ == "__main__":
    # narr_args: size=32 (hidden dim), out_mlp=16, out_tanh=True,
    #            lang_dropout/out_dropout inactive at inference.
    B, S, D, O = 2, 8, 32, 16

    key = jax.random.PRNGKey(0)
    k_h, k_w, k_b = jax.random.split(key, 3)

    # Synthetic "GPT-2 encoder output" (last_hidden_state) and attention mask
    # (right-padded, as produced by the HF tokenizer with padding=True).
    last_hidden_state = jax.random.normal(k_h, (B, S, D), dtype=jnp.float32)
    attention_mask = jnp.array(
        [[1, 1, 1, 1, 1, 1, 1, 1],
         [1, 1, 1, 1, 1, 0, 0, 0]], dtype=jnp.float32)  # [B, S]

    # Deterministic out_mlp params (nn.Linear(D, O) style init), stored [D, O].
    bound = 1.0 / jnp.sqrt(jnp.float32(D))
    out_mlp_w = jax.random.uniform(k_w, (D, O), jnp.float32, -bound, bound)
    out_mlp_b = jax.random.uniform(k_b, (1, O), jnp.float32, -bound, bound)

    emb, attns, mask_out = gpt2layer_forward(
        last_hidden_state, attention_mask, out_mlp_w, out_mlp_b)
    emb = jax.block_until_ready(emb)

    ref = reference_forward(last_hidden_state, attention_mask,
                            out_mlp_w, out_mlp_b)
    assert emb.shape == (B, O)
    assert jnp.allclose(emb, ref, atol=1e-5, rtol=1e-5)

    print("KERNEL_OK")
</pallas_src>

<mosaic_0001>
module attributes {stable_mosaic.version = 11 : i64} {
  func.func @_gpt2layer_tail_kernel(%arg0: i32, %arg1: i32, %arg2: memref<1xi32, #tpu.memory_space<smem>>, %arg3: memref<2x8x32xf32, #tpu.memory_space<vmem>>, %arg4: memref<2x1x1xi32, #tpu.memory_space<vmem>>, %arg5: memref<32x128xf32, #tpu.memory_space<vmem>>, %arg6: memref<1x128xf32, #tpu.memory_space<vmem>>, %arg7: memref<2x128xf32, #tpu.memory_space<vmem>>, %arg8: memref<2x32xf32, #tpu.memory_space<vmem>>) attributes {dimension_semantics = [#tpu.dimension_semantics<parallel>, #tpu.dimension_semantics<arbitrary>], iteration_bounds = array<i64: 1, 1>, scalar_prefetch = 1 : i64, scratch_operands = 1 : i64, tpu.core_type = #tpu.core_type<tc>, window_params = [{transform_indices = @transform_0, window_bounds = array<i64: 2, 8, 32>}, {transform_indices = @transform_1, window_bounds = array<i64: 2, 1, 1>}, {pipeline_mode = #tpu.pipeline_mode<synchronous>, transform_indices = @transform_2, window_bounds = array<i64: 32, 128>}, {pipeline_mode = #tpu.pipeline_mode<synchronous>, transform_indices = @transform_3, window_bounds = array<i64: 1, 128>}, {transform_indices = @transform_4, window_bounds = array<i64: 2, 128>}]} {
    %c0_i32 = arith.constant 0 : i32
    %0 = arith.cmpi eq, %arg1, %c0_i32 : i32
    %1 = arith.extui %0 : i1 to i32
    %c0_i32_0 = arith.constant 0 : i32
    %2 = arith.cmpi ne, %1, %c0_i32_0 : i32
    scf.if %2 {
      %cst = arith.constant 0.000000e+00 : f32
      %11 = vector.broadcast %cst : f32 to vector<2x32xf32>
      %c0 = arith.constant 0 : index
      %c0_4 = arith.constant 0 : index
      %12 = vector.load %arg8[%c0, %c0_4] : memref<2x32xf32, #tpu.memory_space<vmem>>, vector<2x32xf32>
      tpu.vector_store %arg8[%c0, %c0_4], %11 {strides = array<i32>} : memref<2x32xf32, #tpu.memory_space<vmem>>, vector<2x32xf32>,
    } else {
    }
    %3 = arith.index_cast %arg0 : i32 to index
    %4 = memref.load %arg2[%3] : memref<1xi32, #tpu.memory_space<smem>>
    %5 = arith.cmpi sle, %arg1, %4 : i32
    %6 = arith.extui %5 : i1 to i32
    %c0_i32_1 = arith.constant 0 : i32
    %7 = arith.cmpi ne, %6, %c0_i32_1 : i32
    scf.if %7 {
      %c8_i32 = arith.constant 8 : i32
      %11 = arith.muli %arg1, %c8_i32 : i32
      %12 = tpu.iota {dimensions = array<i32: 1>} : vector<2x8x1xi32>
      %13 = vector.broadcast %11 : i32 to vector<2x8x1xi32>
      %14 = arith.addi %12, %13 : vector<2x8x1xi32>
      %c0 = arith.constant 0 : index
      %c0_4 = arith.constant 0 : index
      %c0_5 = arith.constant 0 : index
      %15 = vector.load %arg4[%c0, %c0_4, %c0_5] : memref<2x1x1xi32, #tpu.memory_space<vmem>>, vector<2x1x1xi32>
      %16 = vector.broadcast %15 : vector<2x1x1xi32> to vector<2x8x1xi32>
      %17 = arith.cmpi slt, %14, %16 : vector<2x8x1xi32>
      %c0_6 = arith.constant 0 : index
      %c0_7 = arith.constant 0 : index
      %c0_8 = arith.constant 0 : index
      %18 = vector.load %arg3[%c0_6, %c0_7, %c0_8] : memref<2x8x32xf32, #tpu.memory_space<vmem>>, vector<2x8x32xf32>
      %cst = arith.constant 0.000000e+00 : f32
      %19 = vector.broadcast %cst : f32 to vector<2x8x32xf32>
      %20 = vector.shape_cast %17 : vector<2x8x1xi1> to vector<2x8x1xi1>
      %21 = vector.broadcast %20 : vector<2x8x1xi1> to vector<2x8x32xi1>
      %22 = arith.select %21, %18, %19 : vector<2x8x32xi1>, vector<2x8x32xf32>
      %c0_9 = arith.constant 0 : index
      %c0_10 = arith.constant 0 : index
      %23 = vector.load %arg8[%c0_9, %c0_10] : memref<2x32xf32, #tpu.memory_space<vmem>>, vector<2x32xf32>
      %cst_11 = arith.constant dense<0.000000e+00> : vector<2x32xf32>
      %24 = vector.multi_reduction <add>, %22, %cst_11 [1] : vector<2x8x32xf32> to vector<2x32xf32>
      %25 = arith.addf %23, %24 : vector<2x32xf32>
      %c0_12 = arith.constant 0 : index
      %c0_13 = arith.constant 0 : index
      %26 = vector.load %arg8[%c0_12, %c0_13] : memref<2x32xf32, #tpu.memory_space<vmem>>, vector<2x32xf32>
      tpu.vector_store %arg8[%c0_12, %c0_13], %25 {strides = array<i32>} : memref<2x32xf32, #tpu.memory_space<vmem>>, vector<2x32xf32>,
    } else {
    }
    %c0_i32_2 = arith.constant 0 : i32
    %8 = arith.cmpi eq, %arg1, %c0_i32_2 : i32
    %9 = arith.extui %8 : i1 to i32
    %c0_i32_3 = arith.constant 0 : i32
    %10 = arith.cmpi ne, %9, %c0_i32_3 : i32
    scf.if %10 {
      %c0 = arith.constant 0 : index
      %c0_4 = arith.constant 0 : index
      %11 = vector.load %arg8[%c0, %c0_4] : memref<2x32xf32, #tpu.memory_space<vmem>>, vector<2x32xf32>
      %12 = arith.mulf %11, %11 : vector<2x32xf32>
      %cst = arith.constant dense<0.000000e+00> : vector<2xf32>
      %13 = vector.multi_reduction <add>, %12, %cst [1] : vector<2x32xf32> to vector<2xf32>
      %14 = vector.shape_cast %13 : vector<2xf32> to vector<2x1xf32>
      %cst_5 = arith.constant 1.000000e-24 : f32
      %15 = vector.broadcast %cst_5 : f32 to vector<2x1xf32>
      %16 = arith.maximumf %14, %15 : vector<2x1xf32>
      %17 = math.rsqrt %16 : vector<2x1xf32>
      %18 = vector.broadcast %17 : vector<2x1xf32> to vector<2x32xf32>
      %19 = arith.mulf %11, %18 : vector<2x32xf32>
      %c0_6 = arith.constant 0 : index
      %c0_7 = arith.constant 0 : index
      %20 = vector.load %arg5[%c0_6, %c0_7] : memref<32x128xf32, #tpu.memory_space<vmem>>, vector<32x128xf32>
      %cst_8 = arith.constant dense<0.000000e+00> : vector<2x128xf32>
      %21 = tpu.matmul %19, %20, %cst_8 {dimension_numbers = #tpu.dot_dimension_numbers<[1], [0], [0], [1], [0, 0, 1, 1], [], []>} : vector<2x32xf32>, vector<32x128xf32>, vector<2x128xf32> -> vector<2x128xf32>
      %c0_9 = arith.constant 0 : index
      %c0_10 = arith.constant 0 : index
      %22 = vector.load %arg6[%c0_9, %c0_10] : memref<1x128xf32, #tpu.memory_space<vmem>>, vector<1x128xf32>
      %23 = vector.broadcast %22 : vector<1x128xf32> to vector<2x128xf32>
      %24 = arith.addf %21, %23 : vector<2x128xf32>
      %25 = math.tanh %24 : vector<2x128xf32>
      %c0_11 = arith.constant 0 : index
      %c0_12 = arith.constant 0 : index
      %26 = vector.load %arg7[%c0_11, %c0_12] : memref<2x128xf32, #tpu.memory_space<vmem>>, vector<2x128xf32>
      tpu.vector_store %arg7[%c0_11, %c0_12], %25 {strides = array<i32>} : memref<2x128xf32, #tpu.memory_space<vmem>>, vector<2x128xf32>,
    } else {
    }
    return
  }
  func.func @transform_0(%arg0: i32, %arg1: i32, %arg2: memref<1xi32, #tpu.memory_space<smem>>) -> (i32, i32, i32) {
    %0 = arith.index_cast %arg0 : i32 to index
    %1 = memref.load %arg2[%0] : memref<1xi32, #tpu.memory_space<smem>>
    %2 = arith.minsi %arg1, %1 : i32
    %c0_i32 = arith.constant 0 : i32
    %c0_i32_0 = arith.constant 0 : i32
    return %arg0, %2, %c0_i32 : i32, i32, i32
  }
  func.func @transform_1(%arg0: i32, %arg1: i32, %arg2: memref<1xi32, #tpu.memory_space<smem>>) -> (i32, i32, i32) {
    %c0_i32 = arith.constant 0 : i32
    %c0_i32_0 = arith.constant 0 : i32
    %c0_i32_1 = arith.constant 0 : i32
    return %arg0, %c0_i32, %c0_i32_0 : i32, i32, i32
  }
  func.func @transform_2(%arg0: i32, %arg1: i32, %arg2: memref<1xi32, #tpu.memory_space<smem>>) -> (i32, i32) {
    %c0_i32 = arith.constant 0 : i32
    %c0_i32_0 = arith.constant 0 : i32
    %c0_i32_1 = arith.constant 0 : i32
    return %c0_i32, %c0_i32_0 : i32, i32
  }
  func.func @transform_3(%arg0: i32, %arg1: i32, %arg2: memref<1xi32, #tpu.memory_space<smem>>) -> (i32, i32) {
    %c0_i32 = arith.constant 0 : i32
    %c0_i32_0 = arith.constant 0 : i32
    %c0_i32_1 = arith.constant 0 : i32
    return %c0_i32, %c0_i32_0 : i32, i32
  }
  func.func @transform_4(%arg0: i32, %arg1: i32, %arg2: memref<1xi32, #tpu.memory_space<smem>>) -> (i32, i32) {
    %c0_i32 = arith.constant 0 : i32
    %c0_i32_0 = arith.constant 0 : i32
    return %arg0, %c0_i32 : i32, i32
  }
}

</mosaic_0001>

<bundles_post_ra>
// kernel: tpu_custom_call.1
= control target key start
LH: loop header
LB: loop body
LE: loop exit
PB: predicated region body
PF: predicated region fallthrough
CT: control target
= control target key end

     0   :  { %11 = vsyncpa [#allocation6], 0  ;;  %s450_s0 = inlined_call_operand.<no memory space> [shape: s32[1], index: 0, kind: input, shape index: {}]   ;;  %s451_s1 = inlined_call_operand.hbm [shape: f32[2,8,32], index: 1, kind: input, shape index: {}]   ;;  %s452_s2 = inlined_call_operand.vmem [shape: s32[2,1,1], index: 2, kind: input, shape index: {}]   ;;  %s453_s3 = inlined_call_operand.hbm [shape: f32[32,128], index: 3, kind: input, shape index: {}]   ;;  %s454_s4 = inlined_call_operand.vmem [shape: f32[1,128], index: 4, kind: input, shape index: {}]   ;;  %s455_s5 = inlined_call_operand.hbm [shape: f32[2,128], index: 5, kind: output, shape index: {}]  }
   0x1   :  { %12 = vsyncpa [#allocation9], 0 }
   0x2   :  { %13 = vsyncpa [#allocation7], 0  ;;  %p239_p0 = scmp.gt.s32.totalorder %s450_s0, 0  ;;  %s357_s20 = smov [#allocation5]  }
   0x3   :  { %s24_s21 = sshll.u32 %s357_s20, 4  ;;  %s358_s29 = smov [#allocation8]   ;;  %s25_s21 = int_to_ptr.vmem [resolvable:$true] %s24_s21 }
   0x4   :  { %s18_s24 = scalar_select %p239_p0, 0, %s450_s0 }
   0x5   :  { %s38_s30 = sshll.u32 %s358_s29, 4  ;;  %s285_s9 = scalar_lea.hbm %s451_s1, 256  ;;  %s39_s30 = int_to_ptr.vmem [resolvable:$true] %s38_s30 }
   0x6   :  { %s240_s25 = sshll.u32 %s18_s24, 7 }
   0x7   :  { %s23_s28 = scalar_lea.hbm %s451_s1, %s240_s25 }
   0x8   :  { %s283_s6 = scalar_lea.hbm %s23_s28, 256  ;;  %p286_p2 = scmp.lt.u32.totalorder %s23_s28, %s451_s1 }
   0x9   :  { %p284_p1 = scmp.ne.s32.totalorder %s23_s28, %s283_s6  ;;  %p287_p3 = scmp.lt.u32.totalorder %s285_s9, %s283_s6 }
   0xa   :  { %p289_p5 = scmp.lt.u32.totalorder %s283_s6, %s23_s28 }
   0xb   :  { %p288_p4 = por %p287_p3, %p286_p2 }
   0xd   :  { %p290_p6 = por %p289_p5, %p288_p4 }
   0xf   :  { %p291_p7 = pnand %p290_p6, %p284_p1 }
  0x11   :  { %294 = shalt.err (!%p291_p7)
}
  0x12   :  { %s295_s12 = scalar_lea.vmem %s25_s21, 256  ;;  %p300_p9 = scmp.lt.s32.totalorder %s25_s21, %s25_s21 }
  0x13   :  { %p296_p8 = scmp.ne.s32.totalorder %s25_s21, %s295_s12  ;;  %p301_p10 = scmp.lt.s32.totalorder %s295_s12, %s295_s12 }
  0x15   :  { %p302_p11 = por %p301_p10, %p300_p9 }
  0x17   :  { %p303_p12 = pnand %p302_p11, %p296_p8 }
  0x19   :  { %306 = shalt.err (!%p303_p12)
}
  0x1a   :  { %s359_s13 = smov 128   ;;  %s360_s14 = smov 8  }
  0x1b   :  { %30 = dma.hbm_to_vmem [thread:$0]  %s23_s28, 256, %s25_s21, [#allocation6], %s359_s13, %s359_s13, %s360_s14  }
  0x1c   :  { %s307_s1 = scalar_lea.hbm %s453_s3, 512 }
  0x1d   :  { %p308_p13 = scmp.ne.s32.totalorder %s453_s3, %s307_s1  ;;  %p311_p0 = scmp.lt.u32.totalorder %s307_s1, %s453_s3 }
  0x1f   :  { %p313_p1 = pnand %p311_p0, %p308_p13 }
  0x21   :  { %316 = shalt.err (!%p313_p1)
}
  0x22   :  { %s317_s22 = scalar_lea.vmem %s39_s30, 512  ;;  %p322_p3 = scmp.lt.s32.totalorder %s39_s30, %s39_s30 }
  0x23   :  { %p318_p2 = scmp.ne.s32.totalorder %s39_s30, %s317_s22  ;;  %p323_p4 = scmp.lt.s32.totalorder %s317_s22, %s317_s22 }
  0x25   :  { %p324_p5 = por %p323_p4, %p322_p3 }
  0x27   :  { %p325_p6 = pnand %p324_p5, %p318_p2 }
  0x29   :  { %328 = shalt.err (!%p325_p6)
}
  0x2a   :  { %44 = dma.hbm_to_vmem [thread:$0]  %s453_s3, 512, %s39_s30, [#allocation9], %s359_s13, %s359_s13, %s360_s14  }
  0x2b   :  { %351 = dma.done.wait [#allocation6], 256  }
  0x2c   :  { %352 = vsyncadd [#allocation6], 4294967040 }
  0x2d   :  { %353 = dma.done.wait [#allocation9], 512  }
  0x2e   :  { %354 = vsyncadd [#allocation9], 4294966784  ;;  %vm60_vm0 = vcmask 254976   ;;  %v361_v0 = vmov 0.0   ;;  %p242_p7 = scmp.lt.s32.totalorder %s450_s0, 0 }
  0x2f   :  { %61 = vst.msk [vmem:[#allocation2] sm:$0x3] %vm60_vm0, %v361_v0  ;;  %v68_v1 = vlaneseq (!%p242_p7)  ;;  %v362_v2 = vmov (!%p242_p7), 0   ;;  %v243_v3 = vld [vmem:[%s452_s2] ss:$0 sm:$0xff] (!%p242_p7)  ;;  %v84_v8 = vld [vmem:[#allocation5] sm:$0xff] (!%p242_p7) }
  0x30   :  { %66 = sbr.rel (%p242_p7) target bundleno = 204 (0xcc), region = 33  ;;  %278 = vset.pattern.permute.xlu0 (!%p242_p7), %v362_v2  ;;  %v244_v4 = vld [vmem:[%s452_s2 + $0x1] ss:$0 sm:$0xff] (!%p242_p7)  ;;  %vm99_vm3 = vcmask (!%p242_p7), 261120   ;;  %v85_v12 = vld [vmem:[#allocation5 + $0x8] sm:$0xff] (!%p242_p7)  ;;  %vm116_vm6 = vcmask (!%p242_p7), 1041409  }
  0x31   :  { %v69_v5 = vshrl.u32 (!%p242_p7), %v68_v1, 7 }
  0x33   :  { %vm82_vm1 = vcmp.lt.s32.totalorder (!%p242_p7), %v69_v5, %v243_v3  ;;  %vm83_vm2 = vcmp.lt.s32.totalorder (!%p242_p7), %v69_v5, %v244_v4 }
  0x34   :  { %v86_v6 = vsel (!%p242_p7), %vm82_vm1, 1, %v362_v2  ;;  %v87_v7 = vsel (!%p242_p7), %vm83_vm2, 1, %v362_v2 }
  0x35   :  { %89 = vperm.xlu0 (!%p242_p7), %278, %v86_v6  }
  0x36   :  { %v98_v27 = vld [vmem:[#allocation2] sm:$0x3] (!%p242_p7) }
  0x39   :  { %92 = vperm.xlu0 %278, %v87_v7  }
  0xb4   :  { %v90_v9 = vpop.permute.xlu0 %89 }
  0xb5   :  { %vm94_vm4 = vcmp.eq.s32.totalorder %v90_v9, 1 }
  0xb6   :  { %v96_v10 = vsel %vm94_vm4, %v84_v8, 0.0 }
  0xb7   :  { %v100_v11 = vsel %vm99_vm3, %v96_v10, 0.0 }
  0xb8   :  { %v101_v13 = vrot.slane %v100_v11, 4  ;;  %v93_v14 = vpop.permute.xlu0 %92 }
  0xb9   :  { %vm95_vm5 = vcmp.eq.s32.totalorder %v93_v14, 1 }
  0xba   :  { %v102_v15 = vadd.f32 %v101_v13, %v100_v11  ;;  %v97_v16 = vsel %vm95_vm5, %v85_v12, 0.0 }
  0xbb   :  { %v107_v17 = vsel %vm99_vm3, %v97_v16, 0.0 }
  0xbc   :  { %v103_v18 = vrot.slane %v102_v15, 2  ;;  %v108_v19 = vrot.slane %v107_v17, 4 }
  0xbe   :  { %v104_v20 = vadd.f32 %v103_v18, %v102_v15  ;;  %v109_v21 = vadd.f32 %v108_v19, %v107_v17 }
  0xc0   :  { %v110_v22 = vrot.slane %v109_v21, 2  ;;  %v105_v23 = vrot.slane %v104_v20, 1 }
  0xc2   :  { %v111_v24 = vadd.f32 %v110_v22, %v109_v21  ;;  %v106_v26 = vadd.f32 %v105_v23, %v104_v20 }
  0xc4   :  { %v112_v25 = vrot.slane %v111_v24, 1 }
  0xc6   :  { %v113_v28 = vadd.f32 %v112_v25, %v111_v24 }
  0xc8   :  { %v117_v29 = vsel %vm116_vm6, %v113_v28, %v106_v26 }
  0xc9   :  { %v119_v30 = vadd.f32 %v117_v29, %v98_v27 }
  0xcb   :  { %121 = vst.msk [vmem:[#allocation2] sm:$0x3] %vm60_vm0, %v119_v30 }
  0xcc PF:  { %v134_v34 = vld [vmem:[#allocation8] sm:$0xff]  ;;  %v135_v35 = vld [vmem:[#allocation8 + $0x8] sm:$0xff]  ;;  %v136_v36 = vld [vmem:[#allocation8 + $0x10] sm:$0xff]  ;;  %v363_v37 = vmov 0.0|0.0   ;;  %vm364_vm7 = vmmov 0   ;;  %vm145_vm8 = vcmask 261120  }
  0xcd   :  { %263 = vmatprep.subr.bf16.mxu0 %v363_v37  ;;  %v264_v38 = vpack.c.bf16 %v135_v35, %v134_v34  ;;  %v137_v39 = vld [vmem:[#allocation8 + $0x18] sm:$0xff]  ;;  %260 = vmatprep.mubr.msk.f32.mxu0 %vm364_vm7, %v361_v0  ;;  %v245_v45 = vld [vmem:[%s454_s4] ss:$0 sm:$0xff]  ;;  %s365_s29 = smov [#allocation10]  }
  0xce   :  { %v267_v40 = vpack.c.bf16 %v137_v39, %v136_v36  ;;  %s227_s30 = sshll.u32 %s365_s29, 4  ;;  %s228_s30 = int_to_ptr.vmem [resolvable:$true] %s227_s30 }
  0xcf   :  { %265 = vmatpush3.bf16.msra.mxu0 %v264_v38  ;;  %s329_s6 = scalar_lea.vmem %s228_s30, 32  ;;  %p334_p9 = scmp.lt.s32.totalorder %s228_s30, %s228_s30 }
  0xd0   :  { %266 = vmatprep.subr.bf16.mxu0 %v363_v37  ;;  %p330_p8 = scmp.ne.s32.totalorder %s228_s30, %s329_s6  ;;  %p335_p10 = scmp.lt.s32.totalorder %s329_s6, %s329_s6 }
  0xd2   :  { %v125_v31 = vld [vmem:[#allocation2] sm:$0x3]  ;;  %p336_p11 = por %p335_p10, %p334_p9 }
  0xd3   :  { %v126_v32 = vmul.f32 %v125_v31, %v125_v31  ;;  %268 = vmatpush3.bf16.msra.mxu0 %v267_v40 }
  0xd4   :  { %p337_p12 = pnand %p336_p11, %p330_p8 }
  0xd5   :  { %v128_v33 = vsel %vm60_vm0, %v126_v32, 0.0 }
  0xd6   :  { %129 = vadd.xlane.f32.xlu0 %v128_v33 }
 0x163   :  { %v130_v41 = vpop.xlane.xlu0 %129 }
 0x164   :  { %v131_v42 = vmax.f32 %v130_v41, 1e-24 }
 0x166   :  { %279 = vrsqrt.f32 %v131_v42 }
 0x170   :  { %v280_v43 = vpop.eup %279 }
 0x171   :  { %v133_v44 = vmul.f32 %v280_v43, %v125_v31 }
 0x173   :  { %261 = vmatmul.mubr.msk.f32.vlgmr.msra.gmra.mrb[0].mxu0 %vm145_vm8, %v133_v44 }
 0x246   :  { %v215_v46 = vpop.f32.mrb[0].mxu0 }
 0x247   :  { %v216_v47 = vadd.f32 %v245_v45, %v215_v46  ;;  %v262_v48 = vpop.f32.mrb[1].mxu0 }
 0x249   :  { %281 = vtanh.f32 %v216_v47 }
 0x253   :  { %v282_v49 = vpop.eup %281 }
 0x254   :  { %220 = vst [vmem:[#allocation10] sm:$0x3] %v282_v49 }
 0x255   :  { %340 = shalt.err (!%p337_p12)
}
 0x256   :  { %s341_s4 = scalar_lea.hbm %s455_s5, 32 }
 0x257   :  { %p342_p13 = scmp.ne.s32.totalorder %s455_s5, %s341_s4  ;;  %p345_p0 = scmp.lt.u32.totalorder %s341_s4, %s455_s5 }
 0x259   :  { %p347_p1 = pnand %p345_p0, %p342_p13 }
 0x25b   :  { %350 = shalt.err (!%p347_p1)
}
 0x25c   :  { %230 = dma.vmem_to_hbm [thread:$0]  %s228_s30, 32, %s455_s5, [#allocation7]  }
 0x25d   :  { %355 = dma.done.wait [#allocation7], 32  }
 0x25e   :  { %356 = vsyncadd [#allocation7], 4294967264 }
 0x25f   :  { %234 = vsyncpa [#allocation6], 1 }
 0x260   :  { %235 = vsyncpa [#allocation9], 1 }
 0x261   :  { %236 = vsyncpa [#allocation7], 1 }

</bundles_post_ra>
